<compile_context>
chip_gen: v5e
topology: v5e:2x2
jax: 0.10.0
libtpu: 0.0.40
codegen_flags: <defaults>
</compile_context>

<pallas_src>
import functools

import jax
import jax.numpy as jnp
from jax.experimental import pallas as pl
from jax.experimental.pallas import tpu as pltpu


_OUT_PAD = 128                    # lane-dense padded class dimension
_VMEM_LIMIT = 32 * 1024 * 1024    # explicit cap: safe on v5e (16 MiB default),
                                  # v6e, and under the ~48 MiB v7x budget.
_SCORE_FLOOR = -9e15              # matches torch: where(s > 0, s, -9e15)
_NO_EDGE = -1e30                  # score value for missing edges (kept finite
                                  # so the online softmax never sees inf-inf)


def _round_up(x, m):
    return ((x + m - 1) // m) * m


# ----------------------------------------------------------------------------
# Kernel 1: fused projections (row-tiled over padded N)
#   xc  = x @ [W0 | 0-pad | W1t]   (single MXU matmul; W1t block lane-aligned)
#   x0  = xc[:, :hid0]             (GL_Layer projection, module output)
#   xw  = xc[:, hid0_p:]           (GCN matmul reordering: A @ (x @ W1))
#   p,q = relu(+-x0 * rsqrt(||x0||^2)), zeroed for padded rows
# ----------------------------------------------------------------------------
def _proj_kernel(hid0, hid0_p, n_real, x_ref, wcat_ref,
                 x0_ref, xw_ref, p_ref, q_ref):
    x = x_ref[...]
    xc = jnp.dot(x, wcat_ref[...], preferred_element_type=jnp.float32)
    hid = xw_ref.shape[1]
    x0 = xc[:, :hid0]                      # offset-0 lane slice
    x0_ref[...] = x0
    xw_ref[...] = xc[:, hid0_p:hid0_p + hid]   # 128-aligned lane slice

    # Row-normalize x0.  Real rows with ||x0|| == 0 produce NaN (matches the
    # reference 0/0); zero-padded rows are masked to 0 below so padding cannot
    # NaN-poison real rows through the softmax max/sum.
    inv = jax.lax.rsqrt(jnp.sum(x0 * x0, axis=1, keepdims=True))
    x0n = x0 * inv

    tm = x.shape[0]
    row = pl.program_id(0) * tm + jax.lax.broadcasted_iota(jnp.int32, (tm, 1), 0)
    valid = row < n_real
    p_ref[...] = jnp.where(valid, jnp.maximum(x0n, 0.0), 0.0)
    q_ref[...] = jnp.where(valid, jnp.maximum(-x0n, 0.0), 0.0)


def pallas_proj(x_pad, wcat, *, hid0, hid0_p, hid, n_real, tm):
    n_pad, in_dim = x_pad.shape
    kernel = functools.partial(_proj_kernel, hid0, hid0_p, n_real)
    return pl.pallas_call(
        kernel,
        grid=(n_pad // tm,),
        in_specs=[
            pl.BlockSpec((tm, in_dim), lambda i: (i, 0)),
            pl.BlockSpec((in_dim, hid0_p + hid), lambda i: (0, 0)),
        ],
        out_specs=[
            pl.BlockSpec((tm, hid0), lambda i: (i, 0)),
            pl.BlockSpec((tm, hid), lambda i: (i, 0)),
            pl.BlockSpec((tm, hid0), lambda i: (i, 0)),
            pl.BlockSpec((tm, hid0), lambda i: (i, 0)),
        ],
        out_shape=[
            jax.ShapeDtypeStruct((n_pad, hid0), jnp.float32),
            jax.ShapeDtypeStruct((n_pad, hid), jnp.float32),
            jax.ShapeDtypeStruct((n_pad, hid0), jnp.float32),
            jax.ShapeDtypeStruct((n_pad, hid0), jnp.float32),
        ],
        compiler_params=pltpu.CompilerParams(
            dimension_semantics=("parallel",),
            vmem_limit_bytes=_VMEM_LIMIT,
        ),
    )(x_pad, wcat)


# ----------------------------------------------------------------------------
# Kernel 2: column-tiled online softmax statistics
#   per (row tile i, col tile j):
#     s  = pq_i @ pqa_t_j                 (single MXU matmul, sign-split+a folded)
#     s  = where(s > 0, s, -9e15)         (GL_Layer floor)
#     sm = where(edge, s, -1e30)          (int8 mask tile)
#     running (max m, rescaled sum l)     (scratch, finalized at last j)
#   outputs: m (N,1), scale = has_edge / denom  (zero rows w/o edges == torch
#   sparse-softmax-to-dense semantics; the pure 0/0 reference would give NaN)
# ----------------------------------------------------------------------------
def _stats_kernel(pq_ref, pqat_ref, mask_ref, he_ref, m_ref, scale_ref,
                  m_sc, l_sc):
    j = pl.program_id(1)

    @pl.when(j == 0)
    def _():
        m_sc[...] = jnp.full_like(m_sc, _NO_EDGE)
        l_sc[...] = jnp.zeros_like(l_sc)

    s = jnp.dot(pq_ref[...], pqat_ref[...], preferred_element_type=jnp.float32)
    s = jnp.where(s > 0.0, s, _SCORE_FLOOR)
    sm = jnp.where(mask_ref[...] > 0, s, _NO_EDGE)

    m_old = m_sc[...]
    m_new = jnp.maximum(m_old, jnp.max(sm, axis=1, keepdims=True))
    alpha = jnp.exp(m_old - m_new)
    l_sc[...] = alpha * l_sc[...] + jnp.sum(jnp.exp(sm - m_new), axis=1,
                                            keepdims=True)
    m_sc[...] = m_new

    @pl.when(j == pl.num_programs(1) - 1)
    def _():
        m_ref[...] = m_sc[...]
        # Exact division on a (tm, 1) vector (negligible); avoids the approx-
        # reciprocal row-sum error flagged in review.
        scale_ref[...] = he_ref[...] / jnp.maximum(l_sc[...], 1e-30)


def pallas_softmax_stats(pq, pqa_t, mask_i8, has_edge, *, tm, tn):
    n_pad, k2 = pq.shape
    return pl.pallas_call(
        _stats_kernel,
        grid=(n_pad // tm, n_pad // tn),
        in_specs=[
            pl.BlockSpec((tm, k2), lambda i, j: (i, 0)),
            pl.BlockSpec((k2, tn), lambda i, j: (0, j)),
            pl.BlockSpec((tm, tn), lambda i, j: (i, j)),
            pl.BlockSpec((tm, 1), lambda i, j: (i, 0)),
        ],
        out_specs=[
            pl.BlockSpec((tm, 1), lambda i, j: (i, 0)),
            pl.BlockSpec((tm, 1), lambda i, j: (i, 0)),
        ],
        out_shape=[
            jax.ShapeDtypeStruct((n_pad, 1), jnp.float32),
            jax.ShapeDtypeStruct((n_pad, 1), jnp.float32),
        ],
        scratch_shapes=[pltpu.VMEM((tm, 1), jnp.float32),
                        pltpu.VMEM((tm, 1), jnp.float32)],
        compiler_params=pltpu.CompilerParams(
            dimension_semantics=("parallel", "arbitrary"),
            vmem_limit_bytes=_VMEM_LIMIT,
        ),
    )(pq, pqa_t, mask_i8, has_edge)


# ----------------------------------------------------------------------------
# Kernel 3: A0 emission + GCN aggregation + head (row x column grid)
#   per (i, j):
#     recompute score tile -> A0_ij = exp(sm - m_i) * scale_i  -> write (tm,tn)
#     acc += A0_ij @ xw_j                                       (VMEM scratch)
#   at last j:
#     h0 = acc + b1 ; logits = h0 @ W2pad + b2pad ; lanes >= out_dim -> -inf
#     log_softmax -> lane-dense (tm, 128) store
# ----------------------------------------------------------------------------
def _emit_kernel(out_dim, pq_ref, pqat_ref, mask_ref, m_ref, scale_ref,
                 xw_ref, b1_ref, w2_ref, b2_ref, a0_ref, lp_ref, acc_sc):
    j = pl.program_id(1)

    @pl.when(j == 0)
    def _():
        acc_sc[...] = jnp.zeros_like(acc_sc)

    s = jnp.dot(pq_ref[...], pqat_ref[...], preferred_element_type=jnp.float32)
    s = jnp.where(s > 0.0, s, _SCORE_FLOOR)
    sm = jnp.where(mask_ref[...] > 0, s, _NO_EDGE)
    a0 = jnp.exp(sm - m_ref[...]) * scale_ref[...]
    a0_ref[...] = a0
    acc_sc[...] += jnp.dot(a0, xw_ref[...], preferred_element_type=jnp.float32)

    @pl.when(j == pl.num_programs(1) - 1)
    def _():
        h0 = acc_sc[...] + b1_ref[...]
        logits = (jnp.dot(h0, w2_ref[...], preferred_element_type=jnp.float32)
                  + b2_ref[...])
        lane = jax.lax.broadcasted_iota(jnp.int32, logits.shape, 1)
        logits = jnp.where(lane < out_dim, logits, -jnp.inf)
        z = logits - jnp.max(logits, axis=1, keepdims=True)
        lp_ref[...] = z - jnp.log(jnp.sum(jnp.exp(z), axis=1, keepdims=True))


def pallas_emit(pq, pqa_t, mask_i8, m_rows, scale_rows, xw, b1, w2p, b2p,
                *, out_dim, tm, tn):
    n_pad, k2 = pq.shape
    hid = xw.shape[1]
    out_pad = w2p.shape[1]
    kernel = functools.partial(_emit_kernel, out_dim)
    return pl.pallas_call(
        kernel,
        grid=(n_pad // tm, n_pad // tn),
        in_specs=[
            pl.BlockSpec((tm, k2), lambda i, j: (i, 0)),
            pl.BlockSpec((k2, tn), lambda i, j: (0, j)),
            pl.BlockSpec((tm, tn), lambda i, j: (i, j)),
            pl.BlockSpec((tm, 1), lambda i, j: (i, 0)),
            pl.BlockSpec((tm, 1), lambda i, j: (i, 0)),
            pl.BlockSpec((tn, hid), lambda i, j: (j, 0)),
            pl.BlockSpec((1, hid), lambda i, j: (0, 0)),
            pl.BlockSpec((hid, out_pad), lambda i, j: (0, 0)),
            pl.BlockSpec((1, out_pad), lambda i, j: (0, 0)),
        ],
        out_specs=[
            pl.BlockSpec((tm, tn), lambda i, j: (i, j)),
            pl.BlockSpec((tm, out_pad), lambda i, j: (i, 0)),
        ],
        out_shape=[
            jax.ShapeDtypeStruct((n_pad, n_pad), jnp.float32),
            jax.ShapeDtypeStruct((n_pad, out_pad), jnp.float32),
        ],
        scratch_shapes=[pltpu.VMEM((tm, hid), jnp.float32)],
        compiler_params=pltpu.CompilerParams(
            dimension_semantics=("parallel", "arbitrary"),
            vmem_limit_bytes=_VMEM_LIMIT,
        ),
    )(pq, pqa_t, mask_i8, m_rows, scale_rows, xw, b1, w2p, b2p)


# ----------------------------------------------------------------------------
# GSSL forward
# ----------------------------------------------------------------------------
def gssl_forward(x, edge, params, *, tm=128, tn=256, tm_proj=256):
    # tm/tn are cross-generation-safe defaults; raise toward (256, 512) on
    # v6e/v7x (working set stays a few MiB, well under the 32 MiB cap).
    W0, a0, W1t, b1, W2t, b2 = params
    n, in_dim = x.shape
    hid0 = W0.shape[1]
    hid = W1t.shape[1]
    out_dim = W2t.shape[1]

    n_pad = _round_up(n, max(tm, tn, tm_proj))
    x_pad = jnp.zeros((n_pad, in_dim), jnp.float32).at[:n].set(x)

    # Single fused projection weight; the W1t block starts at a 128-aligned
    # lane offset so the in-kernel split needs no cross-vreg relayout.
    hid0_p = _round_up(hid0, 128)
    wcat = (jnp.zeros((in_dim, hid0_p + hid), jnp.float32)
            .at[:, :hid0].set(W0).at[:, hid0_p:].set(W1t))

    # Kernel 1: x0 (module output), xw = x @ W1t, sign-split normalized rows.
    x0_pad, xw_pad, p_pad, q_pad = pallas_proj(
        x_pad, wcat, hid0=hid0, hid0_p=hid0_p, hid=hid, n_real=n, tm=tm_proj)

    # Layout plumbing on tiny (N, hid0) arrays: fold `a` into the RHS, stack
    # the sign-split halves along the contraction dim and pre-transpose once,
    # so kernels 2/3 run one plain-NN MXU matmul per tile.
    a_row = a0.reshape(1, hid0)
    pq = jnp.concatenate([p_pad, q_pad], axis=1)                        # (N, 2*hid0)
    pqa_t = jnp.concatenate([p_pad * a_row, q_pad * a_row], axis=1).T   # (2*hid0, N)

    # Edge presence: int8 dense mask (4x less HBM than f32) + per-row flag.
    # TODO(synk): replace with CSR row offsets / column indices via
    # PrefetchScalarGridSpec to eliminate the N^2 mask stream entirely.
    e_src, e_dst = edge[0], edge[1]
    mask_i8 = jnp.zeros((n_pad, n_pad), jnp.int8).at[e_src, e_dst].set(1)
    has_edge = (jnp.zeros((n_pad,), jnp.float32).at[e_src].set(1.0)
                ).reshape(n_pad, 1)

    # Lane-dense class padding for the head.
    w2p = jnp.zeros((hid, _OUT_PAD), jnp.float32).at[:, :out_dim].set(W2t)
    b2p = jnp.zeros((1, _OUT_PAD), jnp.float32).at[:, :out_dim].set(b2)

    # Kernel 2: per-row softmax statistics (online max / rescaled sum).
    m_rows, scale_rows = pallas_softmax_stats(pq, pqa_t, mask_i8, has_edge,
                                              tm=tm, tn=tn)

    # Kernel 3: A0 tiles + A0 @ xw accumulation + head Linear + log_softmax.
    A0_pad, lp_pad = pallas_emit(pq, pqa_t, mask_i8, m_rows, scale_rows,
                                 xw_pad, b1, w2p, b2p,
                                 out_dim=out_dim, tm=tm, tn=tn)

    return lp_pad[:n, :out_dim], x0_pad[:n], A0_pad[:n, :n]


# ----------------------------------------------------------------------------
# Pure-JAX reference (mirrors the PyTorch module, eval mode)
# ----------------------------------------------------------------------------
def gssl_reference(x, edge, params):
    W0, a0, W1t, b1, W2t, b2 = params
    n = x.shape[0]
    x0 = x @ W0
    src, dst = edge[0], edge[1]
    xs, xt = x0[src], x0[dst]
    norm = jnp.sqrt(jnp.sum(xs * xs, 1, keepdims=True)
                    * jnp.sum(xt * xt, 1, keepdims=True))
    h = jnp.maximum(xs * xt / norm, 0.0)
    s = (h @ a0)[:, 0]
    s = jnp.where(s > 0, s, -9e15)
    sd = jnp.full((n, n), -jnp.inf, jnp.float32).at[src, dst].set(s)
    m = jnp.zeros((n, n), jnp.float32).at[src, dst].set(1.0)
    row_max = jnp.max(sd, axis=1, keepdims=True)
    e = jnp.where(m > 0, jnp.exp(sd - row_max), 0.0)
    A = e / jnp.sum(e, axis=1, keepdims=True)
    h0 = A @ (x @ W1t) + b1
    logits = h0 @ W2t + b2
    lp = jax.nn.log_softmax(logits, axis=1)
    return lp, x0, A


# ----------------------------------------------------------------------------
# Deterministic parameter init (shapes from GSSL.__init__)
# ----------------------------------------------------------------------------
def init_params(key, in_dim, hid_dim, hid0_dim, out_dim):
    k_w0, k_a, k_w1, k_b1, k_w2, k_b2 = jax.random.split(key, 6)

    def xavier_normal(k, shape):
        fan_in, fan_out = shape[0], shape[1]
        std = (2.0 / (fan_in + fan_out)) ** 0.5
        return std * jax.random.normal(k, shape, jnp.float32)

    W0 = xavier_normal(k_w0, (in_dim, hid0_dim))          # GL_Layer.W
    a0 = xavier_normal(k_a, (hid0_dim, 1))                # GL_Layer.a
    W1t = xavier_normal(k_w1, (in_dim, hid_dim))          # GCN Linear (transposed)
    b1 = 0.01 * jax.random.normal(k_b1, (1, hid_dim), jnp.float32)
    W2t = ((1.0 / hid_dim) ** 0.5) * jax.random.normal(   # head Linear (transposed)
        k_w2, (hid_dim, out_dim), jnp.float32)
    b2 = 0.01 * jax.random.normal(k_b2, (1, out_dim), jnp.float32)
    return (W0, a0, W1t, b1, W2t, b2)


if __name__ == "__main__":
    N, in_dim, hid_dim, hid0_dim, out_dim = 16, 8, 32, 16, 4
    key = jax.random.PRNGKey(0)
    k_x, k_p = jax.random.split(key)

    x = jax.random.normal(k_x, (N, in_dim), jnp.float32)

    # Deterministic, duplicate-free edge list: self-loop, +1 and +3 neighbours.
    idx = jnp.arange(N, dtype=jnp.int32)
    src = jnp.tile(idx, 3)
    dst = jnp.concatenate([idx, (idx + 1) % N, (idx + 3) % N]).astype(jnp.int32)
    edge = jnp.stack([src, dst])                          # (2, E=48)

    params = init_params(k_p, in_dim, hid_dim, hid0_dim, out_dim)

    log_probs, x0, A0 = gssl_forward(x, edge, params)
    jax.block_until_ready((log_probs, x0, A0))

    assert log_probs.shape == (N, out_dim)
    assert x0.shape == (N, hid0_dim)
    assert A0.shape == (N, N)

    # Numerical check vs. pure-JAX reference (matmul reassociation and
    # rsqrt-vs-sqrt introduce small float differences).
    lp_ref, x0_ref, A0_ref = gssl_reference(x, edge, params)
    assert bool(jnp.allclose(x0, x0_ref, atol=1e-2, rtol=1e-2))
    assert bool(jnp.allclose(A0, A0_ref, atol=1e-2, rtol=1e-2))
    assert bool(jnp.allclose(log_probs, lp_ref, atol=1e-2, rtol=1e-2))
    assert bool(jnp.all(jnp.isfinite(log_probs)))
    assert bool(jnp.allclose(jnp.sum(A0, axis=1), jnp.ones((N,)), atol=1e-3))

    print("KERNEL_OK")
</pallas_src>

<mosaic_0001>
module attributes {stable_mosaic.version = 11 : i64} {
  func.func @_proj_kernel(%arg0: i32, %arg1: memref<256x8xf32, #tpu.memory_space<vmem>>, %arg2: memref<8x160xf32, #tpu.memory_space<vmem>>, %arg3: memref<256x16xf32, #tpu.memory_space<vmem>>, %arg4: memref<256x32xf32, #tpu.memory_space<vmem>>, %arg5: memref<256x16xf32, #tpu.memory_space<vmem>>, %arg6: memref<256x16xf32, #tpu.memory_space<vmem>>) attributes {dimension_semantics = [#tpu.dimension_semantics<parallel>], iteration_bounds = array<i64: 1>, scalar_prefetch = 0 : i64, scratch_operands = 0 : i64, tpu.core_type = #tpu.core_type<tc>, window_params = [{transform_indices = @transform_0, window_bounds = array<i64: 256, 8>}, {pipeline_mode = #tpu.pipeline_mode<synchronous>, transform_indices = @transform_1, window_bounds = array<i64: 8, 160>}, {transform_indices = @transform_2, window_bounds = array<i64: 256, 16>}, {transform_indices = @transform_3, window_bounds = array<i64: 256, 32>}, {transform_indices = @transform_4, window_bounds = array<i64: 256, 16>}, {transform_indices = @transform_5, window_bounds = array<i64: 256, 16>}]} {
    %c0 = arith.constant 0 : index
    %c0_0 = arith.constant 0 : index
    %0 = vector.load %arg1[%c0, %c0_0] : memref<256x8xf32, #tpu.memory_space<vmem>>, vector<256x8xf32>
    %c0_1 = arith.constant 0 : index
    %c0_2 = arith.constant 0 : index
    %1 = vector.load %arg2[%c0_1, %c0_2] : memref<8x160xf32, #tpu.memory_space<vmem>>, vector<8x160xf32>
    %cst = arith.constant dense<0.000000e+00> : vector<256x160xf32>
    %2 = tpu.matmul %0, %1, %cst {dimension_numbers = #tpu.dot_dimension_numbers<[1], [0], [0], [1], [0, 0, 1, 1], [], []>} : vector<256x8xf32>, vector<8x160xf32>, vector<256x160xf32> -> vector<256x160xf32>
    %3 = vector.extract_strided_slice %2 {offsets = [0, 0], sizes = [256, 16], strides = [1, 1]} : vector<256x160xf32> to vector<256x16xf32>
    %c0_3 = arith.constant 0 : index
    %c0_4 = arith.constant 0 : index
    %4 = vector.load %arg3[%c0_3, %c0_4] : memref<256x16xf32, #tpu.memory_space<vmem>>, vector<256x16xf32>
    tpu.vector_store %arg3[%c0_3, %c0_4], %3 {strides = array<i32>} : memref<256x16xf32, #tpu.memory_space<vmem>>, vector<256x16xf32>,
    %5 = vector.extract_strided_slice %2 {offsets = [0, 128], sizes = [256, 32], strides = [1, 1]} : vector<256x160xf32> to vector<256x32xf32>
    %c0_5 = arith.constant 0 : index
    %c0_6 = arith.constant 0 : index
    %6 = vector.load %arg4[%c0_5, %c0_6] : memref<256x32xf32, #tpu.memory_space<vmem>>, vector<256x32xf32>
    tpu.vector_store %arg4[%c0_5, %c0_6], %5 {strides = array<i32>} : memref<256x32xf32, #tpu.memory_space<vmem>>, vector<256x32xf32>,
    %7 = arith.mulf %3, %3 : vector<256x16xf32>
    %cst_7 = arith.constant dense<0.000000e+00> : vector<256xf32>
    %8 = vector.multi_reduction <add>, %7, %cst_7 [1] : vector<256x16xf32> to vector<256xf32>
    %9 = vector.shape_cast %8 : vector<256xf32> to vector<256x1xf32>
    %10 = math.rsqrt %9 : vector<256x1xf32>
    %11 = vector.broadcast %10 : vector<256x1xf32> to vector<256x16xf32>
    %12 = arith.mulf %3, %11 : vector<256x16xf32>
    %c256_i32 = arith.constant 256 : i32
    %13 = arith.muli %arg0, %c256_i32 : i32
    %14 = tpu.iota {dimensions = array<i32: 0>} : vector<256x1xi32>
    %15 = vector.broadcast %13 : i32 to vector<256x1xi32>
    %16 = arith.addi %15, %14 : vector<256x1xi32>
    %c16_i32 = arith.constant 16 : i32
    %17 = vector.broadcast %c16_i32 : i32 to vector<256x1xi32>
    %18 = arith.cmpi slt, %16, %17 : vector<256x1xi32>
    %cst_8 = arith.constant 0.000000e+00 : f32
    %19 = vector.broadcast %cst_8 : f32 to vector<256x16xf32>
    %20 = arith.maximumf %12, %19 : vector<256x16xf32>
    %cst_9 = arith.constant 0.000000e+00 : f32
    %21 = vector.shape_cast %18 : vector<256x1xi1> to vector<256x1xi1>
    %22 = vector.broadcast %21 : vector<256x1xi1> to vector<256x16xi1>
    %23 = vector.broadcast %cst_9 : f32 to vector<256x16xf32>
    %24 = arith.select %22, %20, %23 : vector<256x16xi1>, vector<256x16xf32>
    %c0_10 = arith.constant 0 : index
    %c0_11 = arith.constant 0 : index
    %25 = vector.load %arg5[%c0_10, %c0_11] : memref<256x16xf32, #tpu.memory_space<vmem>>, vector<256x16xf32>
    tpu.vector_store %arg5[%c0_10, %c0_11], %24 {strides = array<i32>} : memref<256x16xf32, #tpu.memory_space<vmem>>, vector<256x16xf32>,
    %cst_12 = arith.constant 0.000000e+00 : f32
    %26 = vector.broadcast %cst_12 : f32 to vector<256x16xf32>
    %27 = arith.subf %26, %12 : vector<256x16xf32>
    %cst_13 = arith.constant 0.000000e+00 : f32
    %28 = vector.broadcast %cst_13 : f32 to vector<256x16xf32>
    %29 = arith.maximumf %27, %28 : vector<256x16xf32>
    %cst_14 = arith.constant 0.000000e+00 : f32
    %30 = vector.shape_cast %18 : vector<256x1xi1> to vector<256x1xi1>
    %31 = vector.broadcast %30 : vector<256x1xi1> to vector<256x16xi1>
    %32 = vector.broadcast %cst_14 : f32 to vector<256x16xf32>
    %33 = arith.select %31, %29, %32 : vector<256x16xi1>, vector<256x16xf32>
    %c0_15 = arith.constant 0 : index
    %c0_16 = arith.constant 0 : index
    %34 = vector.load %arg6[%c0_15, %c0_16] : memref<256x16xf32, #tpu.memory_space<vmem>>, vector<256x16xf32>
    tpu.vector_store %arg6[%c0_15, %c0_16], %33 {strides = array<i32>} : memref<256x16xf32, #tpu.memory_space<vmem>>, vector<256x16xf32>,
    return
  }
  func.func @transform_0(%arg0: i32) -> (i32, i32) {
    %c0_i32 = arith.constant 0 : i32
    %c0_i32_0 = arith.constant 0 : i32
    return %arg0, %c0_i32 : i32, i32
  }
  func.func @transform_1(%arg0: i32) -> (i32, i32) {
    %c0_i32 = arith.constant 0 : i32
    %c0_i32_0 = arith.constant 0 : i32
    %c0_i32_1 = arith.constant 0 : i32
    return %c0_i32, %c0_i32_0 : i32, i32
  }
  func.func @transform_2(%arg0: i32) -> (i32, i32) {
    %c0_i32 = arith.constant 0 : i32
    %c0_i32_0 = arith.constant 0 : i32
    return %arg0, %c0_i32 : i32, i32
  }
  func.func @transform_3(%arg0: i32) -> (i32, i32) {
    %c0_i32 = arith.constant 0 : i32
    %c0_i32_0 = arith.constant 0 : i32
    return %arg0, %c0_i32 : i32, i32
  }
  func.func @transform_4(%arg0: i32) -> (i32, i32) {
    %c0_i32 = arith.constant 0 : i32
    %c0_i32_0 = arith.constant 0 : i32
    return %arg0, %c0_i32 : i32, i32
  }
  func.func @transform_5(%arg0: i32) -> (i32, i32) {
    %c0_i32 = arith.constant 0 : i32
    %c0_i32_0 = arith.constant 0 : i32
    return %arg0, %c0_i32 : i32, i32
  }
}

</mosaic_0001>

<bundles_post_ra>
// kernel: tpu_custom_call.1
= control target key start
LH: loop header
LB: loop body
LE: loop exit
PB: predicated region body
PF: predicated region fallthrough
CT: control target
= control target key end

     0   :  { %vm49_vm0 = vcmask 64512   ;;  %vm372_vm1 = vcmask 130048   ;;  %vm405_vm2 = vcmask 261120   ;;  %s2175_s1 = inlined_call_operand.vmem [shape: f32[8,160], index: 1, kind: input, shape index: {}]   ;;  %s2176_s0 = inlined_call_operand.vmem [shape: f32[256,8], index: 0, kind: input, shape index: {}]   ;;  %s2177_s2 = inlined_call_operand.vmem [shape: f32[256,16], index: 2, kind: output, shape index: {0}]   ;;  %s2178_s3 = inlined_call_operand.vmem [shape: f32[256,32], index: 3, kind: output, shape index: {1}]   ;;  %s2179_s4 = inlined_call_operand.vmem [shape: f32[256,16], index: 4, kind: output, shape index: {2}]   ;;  %s2180_s5 = inlined_call_operand.vmem [shape: f32[256,16], index: 5, kind: output, shape index: {3}]  }
   0x1   :  { %v47_v0 = vld [vmem:[%s2175_s1] sm:$0xff]  ;;  %v48_v2 = vld [vmem:[%s2175_s1 + $0x8] sm:$0xff]  ;;  %v17_v6 = vld [vmem:[%s2176_s0 + $0x10] sm:$0xff] }
   0x2   :  { %v15_v1 = vld [vmem:[%s2176_s0] sm:$0xff]  ;;  %161 = vmatpush.msra.mxu0 %v47_v0  ;;  %1385 = vmatpush.msra.mxu2 %v47_v0  ;;  %v16_v4 = vld [vmem:[%s2176_s0 + $0x8] sm:$0xff]  ;;  %v33_v7 = vld [vmem:[%s2176_s0 + $0x90] sm:$0xff] }
   0x3   :  { %v31_v3 = vld [vmem:[%s2176_s0 + $0x80] sm:$0xff]  ;;  %1321 = vmatmul.msk.f32.vlgmr.msra.gmra.mxu0 %vm49_vm0, %v15_v1  ;;  %1386 = vmatpush.msra.mxu3 %v48_v2  ;;  %v32_v5 = vld [vmem:[%s2176_s0 + $0x88] sm:$0xff]  ;;  %v18_v8 = vld [vmem:[%s2176_s0 + $0x18] sm:$0xff] }
   0x4   :  { %1337 = vmatmul.msk.f32.vlgmr.msra.gmra.mxu2 %vm49_vm0, %v31_v3  ;;  %1369 = vmatmul.msk.f32.vlgmr.msra.gmra.mxu3 %vm49_vm0, %v31_v3  ;;  %v34_v9 = vld [vmem:[%s2176_s0 + $0x98] sm:$0xff]  ;;  %v19_v10 = vld [vmem:[%s2176_s0 + $0x20] sm:$0xff]  ;;  %v20_v12 = vld [vmem:[%s2176_s0 + $0x28] sm:$0xff] }
   0x5   :  { %274 = vmatpush.msra.mxu1 %v48_v2  ;;  %v35_v11 = vld [vmem:[%s2176_s0 + $0xa0] sm:$0xff]  ;;  %v36_v13 = vld [vmem:[%s2176_s0 + $0xa8] sm:$0xff]  ;;  %v21_v14 = vld [vmem:[%s2176_s0 + $0x30] sm:$0xff] }
   0x6   :  { %1353 = vmatmul.msk.f32.vlgmr.msra.gmra.mxu1 %vm49_vm0, %v15_v1  ;;  %v37_v15 = vld [vmem:[%s2176_s0 + $0xb0] sm:$0xff]  ;;  %v22_v16 = vld [vmem:[%s2176_s0 + $0x38] sm:$0xff]  ;;  %v23_v18 = vld [vmem:[%s2176_s0 + $0x40] sm:$0xff] }
   0x7   :  { %v38_v17 = vld [vmem:[%s2176_s0 + $0xb8] sm:$0xff]  ;;  %v39_v19 = vld [vmem:[%s2176_s0 + $0xc0] sm:$0xff]  ;;  %v24_v20 = vld [vmem:[%s2176_s0 + $0x48] sm:$0xff] }
   0x8   :  { %v40_v21 = vld [vmem:[%s2176_s0 + $0xc8] sm:$0xff]  ;;  %v25_v22 = vld [vmem:[%s2176_s0 + $0x50] sm:$0xff]  ;;  %v26_v24 = vld [vmem:[%s2176_s0 + $0x58] sm:$0xff] }
   0x9   :  { %v41_v23 = vld [vmem:[%s2176_s0 + $0xd0] sm:$0xff]  ;;  %v42_v25 = vld [vmem:[%s2176_s0 + $0xd8] sm:$0xff]  ;;  %v43_v26 = vld [vmem:[%s2176_s0 + $0xe0] sm:$0xff] }
   0xa   :  { %v27_v27 = vld [vmem:[%s2176_s0 + $0x60] sm:$0xff]  ;;  %v44_v28 = vld [vmem:[%s2176_s0 + $0xe8] sm:$0xff]  ;;  %v29_v30 = vld [vmem:[%s2176_s0 + $0x70] sm:$0xff] }
   0xb   :  { %1322 = vmatmul.msk.f32.gmra.mxu0 %vm49_vm0, %v16_v4  ;;  %v28_v29 = vld [vmem:[%s2176_s0 + $0x68] sm:$0xff]  ;;  %v45_v31 = vld [vmem:[%s2176_s0 + $0xf0] sm:$0xff]  ;;  %v30_v32 = vld [vmem:[%s2176_s0 + $0x78] sm:$0xff] }
   0xc   :  { %1338 = vmatmul.msk.f32.gmra.mxu2 %vm49_vm0, %v32_v5  ;;  %1370 = vmatmul.msk.f32.gmra.mxu3 %vm49_vm0, %v32_v5  ;;  %v46_v33 = vld [vmem:[%s2176_s0 + $0xf8] sm:$0xff] }
   0xe   :  { %1354 = vmatmul.msk.f32.gmra.mxu1 %vm49_vm0, %v16_v4 }
  0x13   :  { %1323 = vmatmul.msk.f32.gmra.mxu0 %vm49_vm0, %v17_v6 }
  0x14   :  { %1339 = vmatmul.msk.f32.gmra.mxu2 %vm49_vm0, %v33_v7  ;;  %1371 = vmatmul.msk.f32.gmra.mxu3 %vm49_vm0, %v33_v7 }
  0x16   :  { %1355 = vmatmul.msk.f32.gmra.mxu1 %vm49_vm0, %v17_v6 }
  0x1b   :  { %1324 = vmatmul.msk.f32.gmra.mxu0 %vm49_vm0, %v18_v8 }
  0x1c   :  { %1340 = vmatmul.msk.f32.gmra.mxu2 %vm49_vm0, %v34_v9  ;;  %1372 = vmatmul.msk.f32.gmra.mxu3 %vm49_vm0, %v34_v9 }
  0x1e   :  { %1356 = vmatmul.msk.f32.gmra.mxu1 %vm49_vm0, %v18_v8  ;;  %v1392_v8 = vmov 0.0  }
  0x1f   :  { %1147 = vst.msk [vmem:[%s2179_s4 + $0x10] sm:$0xff] %vm372_vm1, %v1392_v8 }
  0x20   :  { %1148 = vst.msk [vmem:[%s2179_s4 + $0x18] sm:$0xff] %vm372_vm1, %v1392_v8 }
  0x21   :  { %1149 = vst.msk [vmem:[%s2179_s4 + $0x20] sm:$0xff] %vm372_vm1, %v1392_v8 }
  0x22   :  { %1150 = vst.msk [vmem:[%s2179_s4 + $0x28] sm:$0xff] %vm372_vm1, %v1392_v8 }
  0x23   :  { %1325 = vmatmul.msk.f32.gmra.mxu0 %vm49_vm0, %v19_v10  ;;  %1151 = vst.msk [vmem:[%s2179_s4 + $0x30] sm:$0xff] %vm372_vm1, %v1392_v8 }
  0x24   :  { %1341 = vmatmul.msk.f32.gmra.mxu2 %vm49_vm0, %v35_v11  ;;  %1373 = vmatmul.msk.f32.gmra.mxu3 %vm49_vm0, %v35_v11  ;;  %1152 = vst.msk [vmem:[%s2179_s4 + $0x38] sm:$0xff] %vm372_vm1, %v1392_v8 }
  0x25   :  { %1153 = vst.msk [vmem:[%s2179_s4 + $0x40] sm:$0xff] %vm372_vm1, %v1392_v8 }
  0x26   :  { %1357 = vmatmul.msk.f32.gmra.mxu1 %vm49_vm0, %v19_v10  ;;  %1154 = vst.msk [vmem:[%s2179_s4 + $0x48] sm:$0xff] %vm372_vm1, %v1392_v8 }
  0x27   :  { %1155 = vst.msk [vmem:[%s2179_s4 + $0x50] sm:$0xff] %vm372_vm1, %v1392_v8 }
  0x28   :  { %1156 = vst.msk [vmem:[%s2179_s4 + $0x58] sm:$0xff] %vm372_vm1, %v1392_v8 }
  0x29   :  { %1157 = vst.msk [vmem:[%s2179_s4 + $0x60] sm:$0xff] %vm372_vm1, %v1392_v8 }
  0x2a   :  { %1158 = vst.msk [vmem:[%s2179_s4 + $0x68] sm:$0xff] %vm372_vm1, %v1392_v8 }
  0x2b   :  { %1326 = vmatmul.msk.f32.gmra.mxu0 %vm49_vm0, %v20_v12  ;;  %1159 = vst.msk [vmem:[%s2179_s4 + $0x70] sm:$0xff] %vm372_vm1, %v1392_v8 }
  0x2c   :  { %1342 = vmatmul.msk.f32.gmra.mxu2 %vm49_vm0, %v36_v13  ;;  %1374 = vmatmul.msk.f32.gmra.mxu3 %vm49_vm0, %v36_v13  ;;  %1160 = vst.msk [vmem:[%s2179_s4 + $0x78] sm:$0xff] %vm372_vm1, %v1392_v8 }
  0x2d   :  { %1161 = vst.msk [vmem:[%s2179_s4 + $0x80] sm:$0xff] %vm372_vm1, %v1392_v8 }
  0x2e   :  { %1358 = vmatmul.msk.f32.gmra.mxu1 %vm49_vm0, %v20_v12  ;;  %1162 = vst.msk [vmem:[%s2179_s4 + $0x88] sm:$0xff] %vm372_vm1, %v1392_v8 }
  0x2f   :  { %1163 = vst.msk [vmem:[%s2179_s4 + $0x90] sm:$0xff] %vm372_vm1, %v1392_v8 }
  0x30   :  { %1164 = vst.msk [vmem:[%s2179_s4 + $0x98] sm:$0xff] %vm372_vm1, %v1392_v8 }
  0x31   :  { %1165 = vst.msk [vmem:[%s2179_s4 + $0xa0] sm:$0xff] %vm372_vm1, %v1392_v8 }
  0x32   :  { %1166 = vst.msk [vmem:[%s2179_s4 + $0xa8] sm:$0xff] %vm372_vm1, %v1392_v8 }
  0x33   :  { %1327 = vmatmul.msk.f32.gmra.mxu0 %vm49_vm0, %v21_v14  ;;  %1167 = vst.msk [vmem:[%s2179_s4 + $0xb0] sm:$0xff] %vm372_vm1, %v1392_v8 }
  0x34   :  { %1343 = vmatmul.msk.f32.gmra.mxu2 %vm49_vm0, %v37_v15  ;;  %1375 = vmatmul.msk.f32.gmra.mxu3 %vm49_vm0, %v37_v15  ;;  %1168 = vst.msk [vmem:[%s2179_s4 + $0xb8] sm:$0xff] %vm372_vm1, %v1392_v8 }
  0x35   :  { %1169 = vst.msk [vmem:[%s2179_s4 + $0xc0] sm:$0xff] %vm372_vm1, %v1392_v8 }
  0x36   :  { %1359 = vmatmul.msk.f32.gmra.mxu1 %vm49_vm0, %v21_v14  ;;  %1170 = vst.msk [vmem:[%s2179_s4 + $0xc8] sm:$0xff] %vm372_vm1, %v1392_v8 }
  0x37   :  { %1171 = vst.msk [vmem:[%s2179_s4 + $0xd0] sm:$0xff] %vm372_vm1, %v1392_v8 }
  0x38   :  { %1172 = vst.msk [vmem:[%s2179_s4 + $0xd8] sm:$0xff] %vm372_vm1, %v1392_v8 }
  0x39   :  { %1173 = vst.msk [vmem:[%s2179_s4 + $0xe0] sm:$0xff] %vm372_vm1, %v1392_v8 }
  0x3a   :  { %1174 = vst.msk [vmem:[%s2179_s4 + $0xe8] sm:$0xff] %vm372_vm1, %v1392_v8 }
  0x3b   :  { %1328 = vmatmul.msk.f32.gmra.mxu0 %vm49_vm0, %v22_v16  ;;  %1175 = vst.msk [vmem:[%s2179_s4 + $0xf0] sm:$0xff] %vm372_vm1, %v1392_v8 }
  0x3c   :  { %1344 = vmatmul.msk.f32.gmra.mxu2 %vm49_vm0, %v38_v17  ;;  %1376 = vmatmul.msk.f32.gmra.mxu3 %vm49_vm0, %v38_v17  ;;  %1176 = vst.msk [vmem:[%s2179_s4 + $0xf8] sm:$0xff] %vm372_vm1, %v1392_v8 }
  0x3d   :  { %1275 = vst.msk [vmem:[%s2180_s5 + $0x10] sm:$0xff] %vm372_vm1, %v1392_v8 }
  0x3e   :  { %1360 = vmatmul.msk.f32.gmra.mxu1 %vm49_vm0, %v22_v16  ;;  %1276 = vst.msk [vmem:[%s2180_s5 + $0x18] sm:$0xff] %vm372_vm1, %v1392_v8 }
  0x3f   :  { %1277 = vst.msk [vmem:[%s2180_s5 + $0x20] sm:$0xff] %vm372_vm1, %v1392_v8 }
  0x40   :  { %1278 = vst.msk [vmem:[%s2180_s5 + $0x28] sm:$0xff] %vm372_vm1, %v1392_v8 }
  0x41   :  { %1279 = vst.msk [vmem:[%s2180_s5 + $0x30] sm:$0xff] %vm372_vm1, %v1392_v8 }
  0x42   :  { %1280 = vst.msk [vmem:[%s2180_s5 + $0x38] sm:$0xff] %vm372_vm1, %v1392_v8 }
  0x43   :  { %1329 = vmatmul.msk.f32.gmra.mxu0 %vm49_vm0, %v23_v18  ;;  %1281 = vst.msk [vmem:[%s2180_s5 + $0x40] sm:$0xff] %vm372_vm1, %v1392_v8 }
  0x44   :  { %1345 = vmatmul.msk.f32.gmra.mxu2 %vm49_vm0, %v39_v19  ;;  %1377 = vmatmul.msk.f32.gmra.mxu3 %vm49_vm0, %v39_v19  ;;  %1282 = vst.msk [vmem:[%s2180_s5 + $0x48] sm:$0xff] %vm372_vm1, %v1392_v8 }
  0x45   :  { %1283 = vst.msk [vmem:[%s2180_s5 + $0x50] sm:$0xff] %vm372_vm1, %v1392_v8 }
  0x46   :  { %1361 = vmatmul.msk.f32.gmra.mxu1 %vm49_vm0, %v23_v18  ;;  %1284 = vst.msk [vmem:[%s2180_s5 + $0x58] sm:$0xff] %vm372_vm1, %v1392_v8 }
  0x47   :  { %1285 = vst.msk [vmem:[%s2180_s5 + $0x60] sm:$0xff] %vm372_vm1, %v1392_v8 }
  0x48   :  { %1286 = vst.msk [vmem:[%s2180_s5 + $0x68] sm:$0xff] %vm372_vm1, %v1392_v8 }
  0x49   :  { %1287 = vst.msk [vmem:[%s2180_s5 + $0x70] sm:$0xff] %vm372_vm1, %v1392_v8 }
  0x4a   :  { %1288 = vst.msk [vmem:[%s2180_s5 + $0x78] sm:$0xff] %vm372_vm1, %v1392_v8 }
  0x4b   :  { %1330 = vmatmul.msk.f32.gmra.mxu0 %vm49_vm0, %v24_v20  ;;  %1289 = vst.msk [vmem:[%s2180_s5 + $0x80] sm:$0xff] %vm372_vm1, %v1392_v8 }
  0x4c   :  { %1346 = vmatmul.msk.f32.gmra.mxu2 %vm49_vm0, %v40_v21  ;;  %1378 = vmatmul.msk.f32.gmra.mxu3 %vm49_vm0, %v40_v21  ;;  %1290 = vst.msk [vmem:[%s2180_s5 + $0x88] sm:$0xff] %vm372_vm1, %v1392_v8 }
  0x4d   :  { %1291 = vst.msk [vmem:[%s2180_s5 + $0x90] sm:$0xff] %vm372_vm1, %v1392_v8 }
  0x4e   :  { %1362 = vmatmul.msk.f32.gmra.mxu1 %vm49_vm0, %v24_v20  ;;  %1292 = vst.msk [vmem:[%s2180_s5 + $0x98] sm:$0xff] %vm372_vm1, %v1392_v8 }
  0x4f   :  { %1293 = vst.msk [vmem:[%s2180_s5 + $0xa0] sm:$0xff] %vm372_vm1, %v1392_v8 }
  0x50   :  { %1294 = vst.msk [vmem:[%s2180_s5 + $0xa8] sm:$0xff] %vm372_vm1, %v1392_v8 }
  0x51   :  { %1295 = vst.msk [vmem:[%s2180_s5 + $0xb0] sm:$0xff] %vm372_vm1, %v1392_v8 }
  0x52   :  { %1296 = vst.msk [vmem:[%s2180_s5 + $0xb8] sm:$0xff] %vm372_vm1, %v1392_v8 }
  0x53   :  { %1331 = vmatmul.msk.f32.gmra.mxu0 %vm49_vm0, %v25_v22  ;;  %1297 = vst.msk [vmem:[%s2180_s5 + $0xc0] sm:$0xff] %vm372_vm1, %v1392_v8 }
  0x54   :  { %1347 = vmatmul.msk.f32.gmra.mxu2 %vm49_vm0, %v41_v23  ;;  %1379 = vmatmul.msk.f32.gmra.mxu3 %vm49_vm0, %v41_v23  ;;  %1298 = vst.msk [vmem:[%s2180_s5 + $0xc8] sm:$0xff] %vm372_vm1, %v1392_v8 }
  0x55   :  { %1299 = vst.msk [vmem:[%s2180_s5 + $0xd0] sm:$0xff] %vm372_vm1, %v1392_v8 }
  0x56   :  { %1363 = vmatmul.msk.f32.gmra.mxu1 %vm49_vm0, %v25_v22  ;;  %1300 = vst.msk [vmem:[%s2180_s5 + $0xd8] sm:$0xff] %vm372_vm1, %v1392_v8 }
  0x57   :  { %1301 = vst.msk [vmem:[%s2180_s5 + $0xe0] sm:$0xff] %vm372_vm1, %v1392_v8 }
  0x58   :  { %1302 = vst.msk [vmem:[%s2180_s5 + $0xe8] sm:$0xff] %vm372_vm1, %v1392_v8 }
  0x59   :  { %1303 = vst.msk [vmem:[%s2180_s5 + $0xf0] sm:$0xff] %vm372_vm1, %v1392_v8 }
  0x5a   :  { %1304 = vst.msk [vmem:[%s2180_s5 + $0xf8] sm:$0xff] %vm372_vm1, %v1392_v8 }
  0x5b   :  { %1332 = vmatmul.msk.f32.gmra.mxu0 %vm49_vm0, %v26_v24 }
  0x5c   :  { %1348 = vmatmul.msk.f32.gmra.mxu2 %vm49_vm0, %v42_v25  ;;  %1380 = vmatmul.msk.f32.gmra.mxu3 %vm49_vm0, %v42_v25 }
  0x5e   :  { %1364 = vmatmul.msk.f32.gmra.mxu1 %vm49_vm0, %v26_v24 }
  0x63   :  { %1333 = vmatmul.msk.f32.gmra.mxu0 %vm49_vm0, %v27_v27 }
  0x64   :  { %1349 = vmatmul.msk.f32.gmra.mxu2 %vm49_vm0, %v43_v26  ;;  %1381 = vmatmul.msk.f32.gmra.mxu3 %vm49_vm0, %v43_v26 }
  0x66   :  { %1365 = vmatmul.msk.f32.gmra.mxu1 %vm49_vm0, %v27_v27 }
  0x6b   :  { %1334 = vmatmul.msk.f32.gmra.mxu0 %vm49_vm0, %v28_v29 }
  0x6c   :  { %1350 = vmatmul.msk.f32.gmra.mxu2 %vm49_vm0, %v44_v28  ;;  %1382 = vmatmul.msk.f32.gmra.mxu3 %vm49_vm0, %v44_v28 }
  0x6e   :  { %1366 = vmatmul.msk.f32.gmra.mxu1 %vm49_vm0, %v28_v29 }
  0x73   :  { %1335 = vmatmul.msk.f32.gmra.mxu0 %vm49_vm0, %v29_v30 }
  0x74   :  { %1351 = vmatmul.msk.f32.gmra.mxu2 %vm49_vm0, %v45_v31  ;;  %1383 = vmatmul.msk.f32.gmra.mxu3 %vm49_vm0, %v45_v31 }
  0x76   :  { %1367 = vmatmul.msk.f32.gmra.mxu1 %vm49_vm0, %v29_v30 }
  0x7b   :  { %1336 = vmatmul.msk.f32.gmra.mxu0 %vm49_vm0, %v30_v32 }
  0x7c   :  { %1352 = vmatmul.msk.f32.gmra.mxu2 %vm49_vm0, %v46_v33  ;;  %1384 = vmatmul.msk.f32.gmra.mxu3 %vm49_vm0, %v46_v33 }
  0x7e   :  { %1368 = vmatmul.msk.f32.gmra.mxu1 %vm49_vm0, %v30_v32 }
  0x80   :  { %v1589_v34 = vpop.f32.mrf.mxu0 }
  0x81   :  { %373 = vst.msk [vmem:[%s2177_s2] sm:$0xff] %vm372_vm1, %v1589_v34  ;;  %v438_v35 = vmul.f32 %v1589_v34, %v1589_v34 }
  0x83   :  { %v470_v36 = vsel %vm372_vm1, %v438_v35, 0.0  ;;  %v276_v37 = vpop.f32.mrf.mxu1 }
  0x84   :  { %471 = vadd.xlane.f32.xlu0 %v470_v36  ;;  %406 = vst.msk [vmem:[%s2178_s3] sm:$0xff] %vm405_vm2, %v276_v37 }
  0x87   :  { %v211_v38 = vpop.f32.mrf.mxu2  ;;  %v324_v39 = vpop.f32.mrf.mxu3 }
  0x88   :  { %v1603_v40 = vpop.f32.mrf.mxu0  ;;  %389 = vst.msk [vmem:[%s2177_s2 + $0x80] sm:$0xff] %vm372_vm1, %v211_v38 }
  0x89   :  { %374 = vst.msk [vmem:[%s2177_s2 + $0x8] sm:$0xff] %vm372_vm1, %v1603_v40  ;;  %v439_v41 = vmul.f32 %v1603_v40, %v1603_v40 }
  0x8a   :  { %422 = vst.msk [vmem:[%s2178_s3 + $0x80] sm:$0xff] %vm405_vm2, %v324_v39 }
  0x8b   :  { %v473_v42 = vsel %vm372_vm1, %v439_v41, 0.0  ;;  %v279_v43 = vpop.f32.mrf.mxu1 }
  0x8c   :  { %474 = vadd.xlane.f32.xlu0 %v473_v42  ;;  %407 = vst.msk [vmem:[%s2178_s3 + $0x8] sm:$0xff] %vm405_vm2, %v279_v43 }
  0x8f   :  { %v214_v44 = vpop.f32.mrf.mxu2  ;;  %v327_v45 = vpop.f32.mrf.mxu3 }
  0x90   :  { %390 = vst.msk [vmem:[%s2177_s2 + $0x88] sm:$0xff] %vm372_vm1, %v214_v44  ;;  %v169_v46 = vpop.f32.mrf.mxu0 }
  0x91   :  { %423 = vst.msk [vmem:[%s2178_s3 + $0x88] sm:$0xff] %vm405_vm2, %v327_v45 }
  0x92   :  { %375 = vst.msk [vmem:[%s2177_s2 + $0x10] sm:$0xff] %vm372_vm1, %v169_v46 }
  0x93   :  { %v282_v47 = vpop.f32.mrf.mxu1 }
  0x94   :  { %408 = vst.msk [vmem:[%s2178_s3 + $0x10] sm:$0xff] %vm405_vm2, %v282_v47 }
  0x97   :  { %v217_v48 = vpop.f32.mrf.mxu2  ;;  %v330_v49 = vpop.f32.mrf.mxu3 }
  0x98   :  { %391 = vst.msk [vmem:[%s2177_s2 + $0x90] sm:$0xff] %vm372_vm1, %v217_v48  ;;  %v172_v50 = vpop.f32.mrf.mxu0 }
  0x99   :  { %424 = vst.msk [vmem:[%s2178_s3 + $0x90] sm:$0xff] %vm405_vm2, %v330_v49 }
  0x9a   :  { %376 = vst.msk [vmem:[%s2177_s2 + $0x18] sm:$0xff] %vm372_vm1, %v172_v50 }
  0x9b   :  { %v285_v51 = vpop.f32.mrf.mxu1 }
  0x9c   :  { %409 = vst.msk [vmem:[%s2178_s3 + $0x18] sm:$0xff] %vm405_vm2, %v285_v51 }
  0x9f   :  { %v220_v52 = vpop.f32.mrf.mxu2  ;;  %v333_v53 = vpop.f32.mrf.mxu3 }
  0xa0   :  { %392 = vst.msk [vmem:[%s2177_s2 + $0x98] sm:$0xff] %vm372_vm1, %v220_v52  ;;  %v175_v54 = vpop.f32.mrf.mxu0 }
  0xa1   :  { %425 = vst.msk [vmem:[%s2178_s3 + $0x98] sm:$0xff] %vm405_vm2, %v333_v53 }
  0xa2   :  { %377 = vst.msk [vmem:[%s2177_s2 + $0x20] sm:$0xff] %vm372_vm1, %v175_v54 }
  0xa3   :  { %v288_v55 = vpop.f32.mrf.mxu1 }
  0xa4   :  { %410 = vst.msk [vmem:[%s2178_s3 + $0x20] sm:$0xff] %vm405_vm2, %v288_v55 }
  0xa7   :  { %v223_v56 = vpop.f32.mrf.mxu2  ;;  %v336_v57 = vpop.f32.mrf.mxu3 }
  0xa8   :  { %393 = vst.msk [vmem:[%s2177_s2 + $0xa0] sm:$0xff] %vm372_vm1, %v223_v56  ;;  %v178_v58 = vpop.f32.mrf.mxu0 }
  0xa9   :  { %426 = vst.msk [vmem:[%s2178_s3 + $0xa0] sm:$0xff] %vm405_vm2, %v336_v57 }
  0xaa   :  { %378 = vst.msk [vmem:[%s2177_s2 + $0x28] sm:$0xff] %vm372_vm1, %v178_v58 }
  0xab   :  { %v291_v59 = vpop.f32.mrf.mxu1 }
  0xac   :  { %411 = vst.msk [vmem:[%s2178_s3 + $0x28] sm:$0xff] %vm405_vm2, %v291_v59 }
  0xaf   :  { %v226_v60 = vpop.f32.mrf.mxu2  ;;  %v339_v61 = vpop.f32.mrf.mxu3 }
  0xb0   :  { %394 = vst.msk [vmem:[%s2177_s2 + $0xa8] sm:$0xff] %vm372_vm1, %v226_v60  ;;  %v181_v62 = vpop.f32.mrf.mxu0 }
  0xb1   :  { %427 = vst.msk [vmem:[%s2178_s3 + $0xa8] sm:$0xff] %vm405_vm2, %v339_v61 }
  0xb2   :  { %379 = vst.msk [vmem:[%s2177_s2 + $0x30] sm:$0xff] %vm372_vm1, %v181_v62 }
  0xb3   :  { %v294_v63 = vpop.f32.mrf.mxu1 }
  0xb4   :  { %412 = vst.msk [vmem:[%s2178_s3 + $0x30] sm:$0xff] %vm405_vm2, %v294_v63 }
  0xb7   :  { %v229_v0 = vpop.f32.mrf.mxu2  ;;  %v342_v1 = vpop.f32.mrf.mxu3 }
  0xb8   :  { %395 = vst.msk [vmem:[%s2177_s2 + $0xb0] sm:$0xff] %vm372_vm1, %v229_v0  ;;  %v184_v2 = vpop.f32.mrf.mxu0 }
  0xb9   :  { %428 = vst.msk [vmem:[%s2178_s3 + $0xb0] sm:$0xff] %vm405_vm2, %v342_v1 }
  0xba   :  { %380 = vst.msk [vmem:[%s2177_s2 + $0x38] sm:$0xff] %vm372_vm1, %v184_v2 }
  0xbb   :  { %v297_v3 = vpop.f32.mrf.mxu1 }
  0xbc   :  { %413 = vst.msk [vmem:[%s2178_s3 + $0x38] sm:$0xff] %vm405_vm2, %v297_v3 }
  0xbf   :  { %v232_v4 = vpop.f32.mrf.mxu2  ;;  %v345_v5 = vpop.f32.mrf.mxu3 }
  0xc0   :  { %396 = vst.msk [vmem:[%s2177_s2 + $0xb8] sm:$0xff] %vm372_vm1, %v232_v4  ;;  %v187_v6 = vpop.f32.mrf.mxu0 }
  0xc1   :  { %429 = vst.msk [vmem:[%s2178_s3 + $0xb8] sm:$0xff] %vm405_vm2, %v345_v5 }
  0xc2   :  { %381 = vst.msk [vmem:[%s2177_s2 + $0x40] sm:$0xff] %vm372_vm1, %v187_v6 }
  0xc3   :  { %v300_v7 = vpop.f32.mrf.mxu1 }
  0xc4   :  { %414 = vst.msk [vmem:[%s2178_s3 + $0x40] sm:$0xff] %vm405_vm2, %v300_v7 }
  0xc7   :  { %v235_v9 = vpop.f32.mrf.mxu2  ;;  %v348_v10 = vpop.f32.mrf.mxu3 }
  0xc8   :  { %397 = vst.msk [vmem:[%s2177_s2 + $0xc0] sm:$0xff] %vm372_vm1, %v235_v9  ;;  %v190_v11 = vpop.f32.mrf.mxu0 }
  0xc9   :  { %430 = vst.msk [vmem:[%s2178_s3 + $0xc0] sm:$0xff] %vm405_vm2, %v348_v10 }
  0xca   :  { %382 = vst.msk [vmem:[%s2177_s2 + $0x48] sm:$0xff] %vm372_vm1, %v190_v11 }
  0xcb   :  { %v303_v12 = vpop.f32.mrf.mxu1 }
  0xcc   :  { %415 = vst.msk [vmem:[%s2178_s3 + $0x48] sm:$0xff] %vm405_vm2, %v303_v12 }
  0xcf   :  { %v238_v13 = vpop.f32.mrf.mxu2  ;;  %v351_v14 = vpop.f32.mrf.mxu3 }
  0xd0   :  { %398 = vst.msk [vmem:[%s2177_s2 + $0xc8] sm:$0xff] %vm372_vm1, %v238_v13  ;;  %v193_v15 = vpop.f32.mrf.mxu0 }
  0xd1   :  { %431 = vst.msk [vmem:[%s2178_s3 + $0xc8] sm:$0xff] %vm405_vm2, %v351_v14 }
  0xd2   :  { %383 = vst.msk [vmem:[%s2177_s2 + $0x50] sm:$0xff] %vm372_vm1, %v193_v15 }
  0xd3   :  { %v306_v16 = vpop.f32.mrf.mxu1 }
  0xd4   :  { %416 = vst.msk [vmem:[%s2178_s3 + $0x50] sm:$0xff] %vm405_vm2, %v306_v16 }
  0xd7   :  { %v241_v17 = vpop.f32.mrf.mxu2  ;;  %v354_v18 = vpop.f32.mrf.mxu3 }
  0xd8   :  { %399 = vst.msk [vmem:[%s2177_s2 + $0xd0] sm:$0xff] %vm372_vm1, %v241_v17  ;;  %v196_v22 = vpop.f32.mrf.mxu0 }
  0xd9   :  { %432 = vst.msk [vmem:[%s2178_s3 + $0xd0] sm:$0xff] %vm405_vm2, %v354_v18 }
  0xda   :  { %384 = vst.msk [vmem:[%s2177_s2 + $0x58] sm:$0xff] %vm372_vm1, %v196_v22 }
  0xdb   :  { %v309_v19 = vpop.f32.mrf.mxu1 }
  0xdc   :  { %417 = vst.msk [vmem:[%s2178_s3 + $0x58] sm:$0xff] %vm405_vm2, %v309_v19 }
  0xdf   :  { %v244_v20 = vpop.f32.mrf.mxu2  ;;  %v357_v21 = vpop.f32.mrf.mxu3 }
  0xe0   :  { %400 = vst.msk [vmem:[%s2177_s2 + $0xd8] sm:$0xff] %vm372_vm1, %v244_v20  ;;  %v199_v24 = vpop.f32.mrf.mxu0 }
  0xe1   :  { %433 = vst.msk [vmem:[%s2178_s3 + $0xd8] sm:$0xff] %vm405_vm2, %v357_v21 }
  0xe2   :  { %385 = vst.msk [vmem:[%s2177_s2 + $0x60] sm:$0xff] %vm372_vm1, %v199_v24 }
  0xe3   :  { %v312_v28 = vpop.f32.mrf.mxu1 }
  0xe4   :  { %418 = vst.msk [vmem:[%s2178_s3 + $0x60] sm:$0xff] %vm405_vm2, %v312_v28 }
  0xe7   :  { %v247_v26 = vpop.f32.mrf.mxu2  ;;  %v360_v30 = vpop.f32.mrf.mxu3 }
  0xe8   :  { %v202_v38 = vpop.f32.mrf.mxu0  ;;  %401 = vst.msk [vmem:[%s2177_s2 + $0xe0] sm:$0xff] %vm372_vm1, %v247_v26 }
  0xe9   :  { %434 = vst.msk [vmem:[%s2178_s3 + $0xe0] sm:$0xff] %vm405_vm2, %v360_v30 }
  0xea   :  { %386 = vst.msk [vmem:[%s2177_s2 + $0x68] sm:$0xff] %vm372_vm1, %v202_v38 }
  0xeb   :  { %v315_v43 = vpop.f32.mrf.mxu1 }
  0xec   :  { %419 = vst.msk [vmem:[%s2178_s3 + $0x68] sm:$0xff] %vm405_vm2, %v315_v43 }
  0xef   :  { %v250_v39 = vpop.f32.mrf.mxu2  ;;  %v363_v45 = vpop.f32.mrf.mxu3 }
  0xf0   :  { %v205_v52 = vpop.f32.mrf.mxu0  ;;  %402 = vst.msk [vmem:[%s2177_s2 + $0xe8] sm:$0xff] %vm372_vm1, %v250_v39 }
  0xf1   :  { %435 = vst.msk [vmem:[%s2178_s3 + $0xe8] sm:$0xff] %vm405_vm2, %v363_v45 }
  0xf2   :  { %387 = vst.msk [vmem:[%s2177_s2 + $0x70] sm:$0xff] %vm372_vm1, %v205_v52 }
  0xf3   :  { %v318_v55 = vpop.f32.mrf.mxu1 }
  0xf4   :  { %420 = vst.msk [vmem:[%s2178_s3 + $0x70] sm:$0xff] %vm405_vm2, %v318_v55 }
  0xf7   :  { %v472_v23 = vpop.xlane.xlu0 %471  ;;  %v253_v54 = vpop.f32.mrf.mxu2 }
  0xf8   :  { %1388 = vrsqrt.f32 %v472_v23  ;;  %vm572_vm4 = vweird.f32 %v472_v23  ;;  %v366_v58 = vpop.f32.mrf.mxu3  ;;  %403 = vst.msk [vmem:[%s2177_s2 + $0xf0] sm:$0xff] %vm372_vm1, %v253_v54  ;;  %v208_v59 = vpop.f32.mrf.mxu0 }
  0xf9   :  { %436 = vst.msk [vmem:[%s2178_s3 + $0xf0] sm:$0xff] %vm405_vm2, %v366_v58 }
  0xfa   :  { %388 = vst.msk [vmem:[%s2177_s2 + $0x78] sm:$0xff] %vm372_vm1, %v208_v59 }
  0xfb   :  { %v321_v61 = vpop.f32.mrf.mxu1 }
  0xfc   :  { %421 = vst.msk [vmem:[%s2178_s3 + $0x78] sm:$0xff] %vm405_vm2, %v321_v61 }
  0xfe   :  { %v1389_v25 = vpop.eup %1388 }
  0xff   :  { %v567_v27 = vmul.f32 %v1389_v25, %v472_v23  ;;  %v475_v29 = vpop.xlane.xlu0 %474  ;;  %vm573_vm3 = vweird.f32 %v1389_v25  ;;  %v256_v60 = vpop.f32.mrf.mxu2 }
 0x100   :  { %1390 = vrsqrt.f32 %v475_v29  ;;  %vm574_vm5 = vmor %vm572_vm4, %vm573_vm3  ;;  %vm582_vm7 = vweird.f32 %v475_v29  ;;  %v369_v62 = vpop.f32.mrf.mxu3  ;;  %404 = vst.msk [vmem:[%s2177_s2 + $0xf8] sm:$0xff] %vm372_vm1, %v256_v60 }
 0x101   :  { %v568_v31 = vmul.f32 %v1389_v25, %v567_v27  ;;  %437 = vst.msk [vmem:[%s2178_s3 + $0xf8] sm:$0xff] %vm405_vm2, %v369_v62 }
 0x103   :  { %v569_v32 = vmul.f32 0.5, %v568_v31 }
 0x105   :  { %v570_v33 = vsub.f32 1.5, %v569_v32 }
 0x106   :  { %v1391_v35 = vpop.eup %1390 }
 0x107   :  { %v571_v36 = vmul.f32 %v1389_v25, %v570_v33  ;;  %v577_v37 = vmul.f32 %v1391_v35, %v475_v29  ;;  %vm583_vm6 = vweird.f32 %v1391_v35 }
 0x108   :  { %vm584_vm8 = vmor %vm582_vm7, %vm583_vm6 }
 0x109   :  { %v575_v41 = vsel %vm574_vm5, %v1389_v25, %v571_v36  ;;  %v578_v42 = vmul.f32 %v1391_v35, %v577_v37 }
 0x10a   :  { %v886_v44 = vmul.f32 %v575_v41, %v1589_v34 }
 0x10b   :  { %v579_v46 = vmul.f32 0.5, %v578_v42 }
 0x10c   :  { %v1017_v47 = vmax.f32 %v886_v44, 0.0  ;;  %v1177_v48 = vsub.f32 0.0, %v886_v44 }
 0x10d   :  { %v580_v34 = vsub.f32 1.5, %v579_v46 }
 0x10e   :  { %1145 = vst.msk [vmem:[%s2179_s4] sm:$0xff] %vm372_vm1, %v1017_v47  ;;  %v1209_v49 = vmax.f32 %v1177_v48, 0.0 }
 0x10f   :  { %v581_v50 = vmul.f32 %v1391_v35, %v580_v34 }
 0x110   :  { %1273 = vst.msk [vmem:[%s2180_s5] sm:$0xff] %vm372_vm1, %v1209_v49 }
 0x111   :  { %v585_v51 = vsel %vm584_vm8, %v1391_v35, %v581_v50 }
 0x112   :  { %v887_v53 = vmul.f32 %v585_v51, %v1603_v40 }
 0x114   :  { %v1018_v56 = vmax.f32 %v887_v53, 0.0  ;;  %v1178_v57 = vsub.f32 0.0, %v887_v53 }
 0x116   :  { %1146 = vst.msk [vmem:[%s2179_s4 + $0x8] sm:$0xff] %vm372_vm1, %v1018_v56  ;;  %v1210_v40 = vmax.f32 %v1178_v57, 0.0 }
 0x118   :  { %1274 = vst.msk [vmem:[%s2180_s5 + $0x8] sm:$0xff] %vm372_vm1, %v1210_v40 }

</bundles_post_ra>
